<compile_context>
chip_gen: v5e
topology: v5e:2x2
jax: 0.10.0
libtpu: 0.0.40
codegen_flags: <defaults>
</compile_context>

<pallas_src>
import functools

import jax
import jax.numpy as jnp
from jax.experimental import pallas as pl
from jax.experimental.pallas import tpu as pltpu


def _round_up(x, m):
    return (x + m - 1) // m * m


def _normal_dist_kernel(x_ref, w_ref, p_ref, o_ref, *, n_action_values):
    """One batch tile: o[:, :A] = x @ W + bias ; o[:, A:] = exp(log_std)."""
    A = n_action_values
    # MXU matmul with f32 accumulate; bias row (1, A) broadcasts over the tile.
    mean = jnp.dot(x_ref[...], w_ref[...], preferred_element_type=jnp.float32)
    mean = mean + p_ref[0:1, :]                      # p_ref row 0 = bias
    # exp runs on the EUP (its own bundle slot); computed once per tile.
    std = jnp.exp(p_ref[1:2, :])                     # p_ref row 1 = log_std
    # Two direct slab writes instead of jnp.concatenate: no extra (tb, 2A)
    # temporary, no cross-lane shuffle before the store.
    o_ref[:, :A] = mean.astype(o_ref.dtype)
    o_ref[:, A:] = jnp.broadcast_to(std, mean.shape).astype(o_ref.dtype)


def _fused_xla_forward(x, weight_t, bias, log_std):
    """Reference / small-batch fast path: plain fused XLA expression."""
    mean = x @ weight_t + bias
    std = jnp.broadcast_to(jnp.exp(log_std), mean.shape)
    return jnp.concatenate([mean, std], axis=-1)


def normal_distribution_forward(x, weight_t, bias, log_std, *,
                                block_b=8192, min_pallas_batch=1024):
    """x: (B, F) f32, weight_t: (F, A) f32 (pre-transposed nn.Linear weight),
    bias: (1, A) f32, log_std: (1, A) f32.  Returns (B, 2A) = [mean | std]."""
    B, F = x.shape
    A = weight_t.shape[1]

    # Small-batch fast path: at tiny B the pallas_call launch + one grid step
    # dominates the ~8K FLOP workload by orders of magnitude.  Also covers
    # B < 8 where a batch tile could not satisfy the (8, .) sublane rule.
    if B < 8 or B < min_pallas_batch:
        return _fused_xla_forward(x, weight_t, bias, log_std)

    # Pack the two tiny per-feature parameter rows into a single (2, A) array
    # so the kernel sees one grid-invariant parameter DMA instead of two.
    params = jnp.concatenate([bias, log_std], axis=0)   # (2, A)

    # Batch tile selection:
    #   * block_b sanitized to a multiple of 8 (sublane rule),
    #   * hard cap 16384 rows -> double-buffered x+out ~= 12 MiB, safely under
    #     v5e's 16 MiB scoped-VMEM default (v6e/v7x have 32 MiB),
    #   * at least 4 blocks for large B so v7x's two TensorCores each get >= 2
    #     grid steps (megacore split + double-buffer overlap),
    #   * never larger than the (8-rounded) batch itself.
    tb_cap = 16384
    tb = min(
        _round_up(max(block_b, 8), 8),
        tb_cap,
        max(8, _round_up(pl.cdiv(B, 4), 8)),
        _round_up(B, 8),
    )
    # Ragged last block: Pallas masks OOB reads/writes, so no jnp.pad / out[:B]
    # copies are needed even when tb does not divide B.
    n_blocks = pl.cdiv(B, tb)

    kernel = functools.partial(_normal_dist_kernel, n_action_values=A)

    return pl.pallas_call(
        kernel,
        out_shape=jax.ShapeDtypeStruct((B, 2 * A), x.dtype),
        grid_spec=pltpu.PrefetchScalarGridSpec(
            num_scalar_prefetch=0,
            grid=(n_blocks,),
            in_specs=[
                # x: tiled along the batch axis; prefetch of tile i+1 overlaps
                # the matmul of tile i (auto double-buffering).
                pl.BlockSpec((tb, F), lambda i: (i, 0)),
                # Weight and packed (bias, log_std) are grid-invariant: they
                # stay resident in VMEM across all batch tiles.
                pl.BlockSpec((F, A), lambda i: (0, 0)),
                pl.BlockSpec((2, A), lambda i: (0, 0)),
            ],
            out_specs=pl.BlockSpec((tb, 2 * A), lambda i: (i, 0)),
        ),
        compiler_params=pltpu.CompilerParams(
            # Batch axis is embarrassingly parallel -> megacore split.
            dimension_semantics=("parallel",),
        ),
    )(x, weight_t, params)


if __name__ == "__main__":
    key = jax.random.PRNGKey(0)
    k_x, k_w, k_b, k_x2 = jax.random.split(key, 4)

    in_features = 32
    n_action_values = 16

    # Deterministic parameter init (shapes from the module's __init__).
    # nn.Linear weight is (n_action_values, in_features); we store its transpose.
    bound = 1.0 / jnp.sqrt(in_features)
    weight_t = jax.random.uniform(
        k_w, (in_features, n_action_values), jnp.float32, minval=-bound, maxval=bound)
    bias = jax.random.uniform(
        k_b, (1, n_action_values), jnp.float32, minval=-bound, maxval=bound)
    # policy_std parameter is initialized to zeros in the module; keep that.
    log_std = jnp.zeros((1, n_action_values), jnp.float32)

    # 1) Small shape forced through the Pallas kernel (single 8-row block).
    x_small = jax.random.normal(k_x, (8, in_features), jnp.float32)
    out = jax.block_until_ready(
        normal_distribution_forward(x_small, weight_t, bias, log_std,
                                    min_pallas_batch=0))
    ref = _fused_xla_forward(x_small, weight_t, bias, log_std)
    assert out.shape == (8, 2 * n_action_values)
    assert jnp.allclose(out, ref, atol=1e-5, rtol=1e-5)

    # 2) Ragged multi-block batch through default dispatch (Pallas path):
    #    exercises the cdiv grid + masked last block (no pad/slice copies).
    x_big = jax.random.normal(k_x2, (2053, in_features), jnp.float32)
    out_big = jax.block_until_ready(
        normal_distribution_forward(x_big, weight_t, bias, log_std))
    ref_big = _fused_xla_forward(x_big, weight_t, bias, log_std)
    assert out_big.shape == (2053, 2 * n_action_values)
    assert jnp.allclose(out_big, ref_big, atol=1e-5, rtol=1e-5)

    # 3) Production-size small batch hits the fused-XLA fast path.
    out_fast = jax.block_until_ready(
        normal_distribution_forward(x_small, weight_t, bias, log_std))
    assert jnp.allclose(out_fast, ref, atol=1e-5, rtol=1e-5)

    print("KERNEL_OK")
</pallas_src>

<mosaic_0001>
module attributes {stable_mosaic.version = 11 : i64} {
  func.func @_normal_dist_kernel(%arg0: i32, %arg1: memref<8x32xf32, #tpu.memory_space<vmem>>, %arg2: memref<32x16xf32, #tpu.memory_space<vmem>>, %arg3: memref<2x16xf32, #tpu.memory_space<vmem>>, %arg4: memref<8x32xf32, #tpu.memory_space<vmem>>) attributes {dimension_semantics = [#tpu.dimension_semantics<parallel>], iteration_bounds = array<i64: 1>, scalar_prefetch = 0 : i64, scratch_operands = 0 : i64, tpu.core_type = #tpu.core_type<tc>, window_params = [{transform_indices = @transform_0, window_bounds = array<i64: 8, 32>}, {pipeline_mode = #tpu.pipeline_mode<synchronous>, transform_indices = @transform_1, window_bounds = array<i64: 32, 16>}, {pipeline_mode = #tpu.pipeline_mode<synchronous>, transform_indices = @transform_2, window_bounds = array<i64: 2, 16>}, {transform_indices = @transform_3, window_bounds = array<i64: 8, 32>}]} {
    %c0 = arith.constant 0 : index
    %c0_0 = arith.constant 0 : index
    %0 = vector.load %arg1[%c0, %c0_0] : memref<8x32xf32, #tpu.memory_space<vmem>>, vector<8x32xf32>
    %c0_1 = arith.constant 0 : index
    %c0_2 = arith.constant 0 : index
    %1 = vector.load %arg2[%c0_1, %c0_2] : memref<32x16xf32, #tpu.memory_space<vmem>>, vector<32x16xf32>
    %cst = arith.constant dense<0.000000e+00> : vector<8x16xf32>
    %2 = tpu.matmul %0, %1, %cst {dimension_numbers = #tpu.dot_dimension_numbers<[1], [0], [0], [1], [0, 0, 1, 1], [], []>} : vector<8x32xf32>, vector<32x16xf32>, vector<8x16xf32> -> vector<8x16xf32>
    %c0_3 = arith.constant 0 : index
    %c0_4 = arith.constant 0 : index
    %3 = vector.load %arg3[%c0_3, %c0_4] : memref<2x16xf32, #tpu.memory_space<vmem>>, vector<1x16xf32>
    %4 = vector.broadcast %3 : vector<1x16xf32> to vector<8x16xf32>
    %5 = arith.addf %2, %4 : vector<8x16xf32>
    %c1 = arith.constant 1 : index
    %c0_5 = arith.constant 0 : index
    %6 = vector.load %arg3[%c1, %c0_5] : memref<2x16xf32, #tpu.memory_space<vmem>>, vector<1x16xf32>
    %7 = math.exp %6 : vector<1x16xf32>
    %c0_6 = arith.constant 0 : index
    %c0_7 = arith.constant 0 : index
    %8 = vector.load %arg4[%c0_6, %c0_7] : memref<8x32xf32, #tpu.memory_space<vmem>>, vector<8x16xf32>
    tpu.vector_store %arg4[%c0_6, %c0_7], %5 {strides = array<i32>} : memref<8x32xf32, #tpu.memory_space<vmem>>, vector<8x16xf32>,
    %9 = vector.shape_cast %7 : vector<1x16xf32> to vector<1x16xf32>
    %10 = vector.broadcast %9 : vector<1x16xf32> to vector<8x16xf32>
    %c0_8 = arith.constant 0 : index
    %c16 = arith.constant 16 : index
    %11 = vector.load %arg4[%c0_8, %c16] : memref<8x32xf32, #tpu.memory_space<vmem>>, vector<8x16xf32>
    tpu.vector_store %arg4[%c0_8, %c16], %10 {strides = array<i32>} : memref<8x32xf32, #tpu.memory_space<vmem>>, vector<8x16xf32>,
    return
  }
  func.func @transform_0(%arg0: i32) -> (i32, i32) {
    %c0_i32 = arith.constant 0 : i32
    %c0_i32_0 = arith.constant 0 : i32
    return %arg0, %c0_i32 : i32, i32
  }
  func.func @transform_1(%arg0: i32) -> (i32, i32) {
    %c0_i32 = arith.constant 0 : i32
    %c0_i32_0 = arith.constant 0 : i32
    %c0_i32_1 = arith.constant 0 : i32
    return %c0_i32, %c0_i32_0 : i32, i32
  }
  func.func @transform_2(%arg0: i32) -> (i32, i32) {
    %c0_i32 = arith.constant 0 : i32
    %c0_i32_0 = arith.constant 0 : i32
    %c0_i32_1 = arith.constant 0 : i32
    return %c0_i32, %c0_i32_0 : i32, i32
  }
  func.func @transform_3(%arg0: i32) -> (i32, i32) {
    %c0_i32 = arith.constant 0 : i32
    %c0_i32_0 = arith.constant 0 : i32
    return %arg0, %c0_i32 : i32, i32
  }
}

</mosaic_0001>

<bundles_post_ra>
// kernel: tpu_custom_call.1
= control target key start
LH: loop header
LB: loop body
LE: loop exit
PB: predicated region body
PF: predicated region fallthrough
CT: control target
= control target key end

     0   :  { %s152_s0 = inlined_call_operand.vmem [shape: f32[8,32], index: 0, kind: input, shape index: {}]   ;;  %s153_s1 = inlined_call_operand.vmem [shape: f32[32,16], index: 1, kind: input, shape index: {}]   ;;  %s154_s2 = inlined_call_operand.vmem [shape: f32[2,16], index: 2, kind: input, shape index: {}]   ;;  %s155_s3 = inlined_call_operand.hbm [shape: f32[8,32], index: 3, kind: output, shape index: {}]  }
   0x1   :  { %v19_v0 = vld [vmem:[%s153_s1 + $0x18] sm:$0xff]  ;;  %v18_v1 = vld [vmem:[%s153_s1 + $0x10] sm:$0xff]  ;;  %v46_v2 = vld [vmem:[%s154_s2 + $0x1] sm:$0x1] }
   0x2   :  { %38 = vmatpush.msra.mxu0 %v19_v0  ;;  %v17_v3 = vld [vmem:[%s153_s1 + $0x8] sm:$0xff]  ;;  %v47_v4 = vmul.f32 1.442695, %v46_v2 }
   0x4   :  { %39 = vmatpush.msra.mxu0 %v18_v1 }
   0x5   :  { %8 = vsyncpa [#allocation3], 0  ;;  %v16_v5 = vld [vmem:[%s153_s1] sm:$0xff]  ;;  %78 = vpow2.f32 %v47_v4  ;;  %vm22_vm0 = vcmask 261120   ;;  %s106_s24 = smov 16   ;;  %s107_s27 = smov [#allocation2]  }
   0x6   :  { %40 = vmatpush.msra.mxu0 %v17_v3  ;;  %v15_v6 = vld [vmem:[%s152_s0] sm:$0xff]  ;;  %s63_s28 = sshll.u32 %s107_s27, 4  ;;  %s65_s30 = sshll.u32 %s155_s3, 4  ;;  %vm49_vm1 = vcmask 130048   ;;  %vm56_vm2 = vcmask 261248   ;;  %s64_s28 = int_to_ptr.vmem [resolvable:$true] %s63_s28  ;;  %s66_s30 = int_to_ptr.hbm [resolvable:$true] %s65_s30 }
   0x7   :  { %v77_v9 = vld [vmem:[%s154_s2] ss:$0 sm:$0xff] }
   0x8   :  { %41 = vmatpush.msra.mxu0 %v16_v5 }
   0x9   :  { %74 = vmatmul.msk.f32.vlgmr.msra.gmra.mxu0 %vm22_vm0, %v15_v6 }
   0xb   :  { %v79_v7 = vpop.eup %78 }
   0xc   :  { %v51_v8 = vperm.slane %v79_v7, 0 }
   0xe   :  { %53 = vrot.lane.b32.xlu0 %v51_v8, %s106_s24 }
  0x80   :  { %v54_v12 = vpop.permute.xlu0 %53 }
  0x86   :  { %v43_v10 = vpop.f32.mrf.mxu0 }
  0x87   :  { %v44_v11 = vadd.f32 %v77_v9, %v43_v10 }
  0x89   :  { %50 = vst.msk [vmem:[#allocation2] sm:$0xff] %vm49_vm1, %v44_v11 }
  0x8a   :  { %57 = vst.msk [vmem:[#allocation2] sm:$0xff] %vm56_vm2, %v54_v12 }
  0x8b   :  { %68 = dma.vmem_to_hbm [thread:$0]  %s64_s28, 128, %s66_s30, [#allocation3]  }
  0x8c   :  { %104 = dma.done.wait [#allocation3], 128  }
  0x8d   :  { %105 = vsyncadd [#allocation3], 4294967168 }
  0x8e   :  { %73 = vsyncpa [#allocation3], 1 }

</bundles_post_ra>
